<compile_context>
chip_gen: v6e
topology: v6e:2x2x1
jax: 0.10.0
libtpu: 0.0.40
codegen_flags: <defaults>
</compile_context>

<pallas_src>
import functools

import jax
import jax.numpy as jnp
from jax.experimental import pallas as pl
from jax.experimental.pallas import tpu as pltpu

LANE = 128
VMEM_LIMIT = 32 * 1024 * 1024   # safe scoped ceiling on v5e/v6e/v7x


def _round_up(a, b):
    return (a + b - 1) // b * b


def _choose_tile(total_rows, cap, mult):
    """Tile height: multiple of `mult`, <= cap, >=2 tiles when possible."""
    total = _round_up(max(int(total_rows), 1), mult)
    if total <= mult:
        return mult
    if total <= cap:
        # split into (at least) two tiles so v7x's two TensorCores both work
        half = _round_up(pl.cdiv(total, 2), mult)
        return min(half, total)
    return cap


# --------------------- kernel 1: fused (d_liner ∘ folded f_liner) -------------
def _node_kernel(x_ref, w_ref, ab_ref):
    # x: [TM, Cin], w_eff: [Cin, 2] -> ab: [TM, 2]
    ab_ref[...] = jnp.dot(
        x_ref[...], w_ref[...], preferred_element_type=jnp.float32
    ).astype(ab_ref.dtype)


def _node_scores(x, w_eff):
    N, Cin = x.shape
    TM = _choose_tile(N, 4096, 8)
    N_pad = _round_up(max(N, TM), TM)
    if N_pad != N:
        x = jnp.pad(x, ((0, N_pad - N), (0, 0)))
    return pl.pallas_call(
        _node_kernel,
        out_shape=jax.ShapeDtypeStruct((N_pad, 2), jnp.float32),
        grid=(N_pad // TM,),
        in_specs=[
            pl.BlockSpec((TM, Cin), lambda i: (i, 0)),
            pl.BlockSpec((Cin, 2), lambda i: (0, 0)),   # resident folded weight
        ],
        out_specs=pl.BlockSpec((TM, 2), lambda i: (i, 0)),
        compiler_params=pltpu.CompilerParams(
            dimension_semantics=("parallel",),
            vmem_limit_bytes=VMEM_LIMIT),
    )(x, w_eff)


# --------------- kernel 2: edge scoring + sigmoid + FocalLoss -----------------
def _edge_kernel(asrc_ref, bdst_ref, lbl_ref, msk_ref,
                 score_ref, num_ref, cnt_ref, *, alpha, gamma):
    s = asrc_ref[...] + bdst_ref[...]            # [TR, 128] pre-sigmoid score
    score = jax.nn.sigmoid(s)                    # Big_EC sigmoid
    score_ref[...] = score

    # FocalLoss — NOTE: the PyTorch reference applies sigmoid to its
    # (already sigmoided) input again; kept on purpose to match it.
    p = jax.nn.sigmoid(score)
    is_pos = lbl_ref[...] == 1.0                 # bf16 0/1 labels, exact compare
    msk = msk_ref[...].astype(jnp.float32)       # 0./1. (padding carries 0.)

    # pt = where(lbl==1, p, 1-p); logpt = log(pt)  (no second log, no exp)
    pt = jnp.where(is_pos, p, 1.0 - p)
    logpt = jnp.log(pt)
    # alpha tensor = [alpha, 1 - alpha]; at = alpha_tensor.gather(0, target)
    at = jnp.where(is_pos, 1.0 - alpha, alpha)
    one_minus_pt = 1.0 - pt
    if gamma == 2.0:                             # integer power -> plain VPU mul
        focal = one_minus_pt * one_minus_pt
    else:
        focal = one_minus_pt ** gamma
    per_edge = -1.0 * focal * (logpt * at)

    w = per_edge * msk                           # padded rows contribute 0
    # Per-tile partial sums folded down to one (8, 128) block each so the grid
    # axis stays "parallel"; the final reduce + single divide happens in JAX.
    num_ref[...] = jnp.sum(w.reshape(-1, 8, LANE), axis=0)
    cnt_ref[...] = jnp.sum(msk.reshape(-1, 8, LANE), axis=0)


# ------------------------------- module wrapper --------------------------------
def big_ec_forward(params, x, edge_index, edge_labels, edge_train_mask,
                   *, alpha, gamma):
    wd = params["wd"]                  # [Cout, Cin]  (PyTorch nn.Linear layout)
    wf = params["wf"]                  # [1, 3*Cout]
    Cout = wd.shape[0]

    # Fold f_liner: cat(hs, hd, hs-hd) @ wf^T == hs @ (w1+w3) + hd @ (w2-w3),
    # then pre-fold through d_liner: w_eff = Wd^T @ [w1+w3, w2-w3]  -> [Cin, 2]
    w1 = wf[0, :Cout]
    w2 = wf[0, Cout:2 * Cout]
    w3 = wf[0, 2 * Cout:]
    w_pair = jnp.stack([w1 + w3, w2 - w3], axis=1).astype(jnp.float32)  # [Cout,2]
    w_eff = (wd.T.astype(jnp.float32) @ w_pair).astype(x.dtype)         # [Cin, 2]

    # TODO(synk): nn.Dropout is identity in eval mode; not applied here.
    ab = _node_scores(x, w_eff)                  # [N_pad, 2] f32

    # Data-dependent gather of just 2 scalars per edge (tiny; stays in XLA).
    src, dst = edge_index[0], edge_index[1]
    a_src = jnp.take(ab[:, 0], src)              # [E]
    b_dst = jnp.take(ab[:, 1], dst)              # [E]

    E = src.shape[0]
    lbl = edge_labels.reshape(E)
    msk = edge_train_mask.reshape(E)

    # Lane-dense [rows, 128] slabs; rows padded to a multiple of the tile.
    rows = pl.cdiv(E, LANE)
    TR = _choose_tile(rows, 2048, 16)            # mult of 16 for bf16 inputs
    rows_pad = _round_up(max(rows, TR), TR)
    E_pad = rows_pad * LANE
    num_tiles = rows_pad // TR

    def _slab(v, dt):
        return jnp.pad(v.astype(dt), (0, E_pad - E)).reshape(rows_pad, LANE)

    a_s = _slab(a_src, jnp.float32)
    b_s = _slab(b_dst, jnp.float32)
    lbl_s = _slab(lbl, jnp.bfloat16)             # 0/1 exact in bf16
    msk_s = _slab(msk, jnp.bfloat16)

    kernel = functools.partial(_edge_kernel, alpha=float(alpha),
                               gamma=float(gamma))
    tile_spec = lambda: pl.BlockSpec((TR, LANE), lambda i: (i, 0))
    part_spec = lambda: pl.BlockSpec((8, LANE), lambda i: (i, 0))

    score_s, num_parts, cnt_parts = pl.pallas_call(
        kernel,
        out_shape=(
            jax.ShapeDtypeStruct((rows_pad, LANE), jnp.float32),
            jax.ShapeDtypeStruct((num_tiles * 8, LANE), jnp.float32),
            jax.ShapeDtypeStruct((num_tiles * 8, LANE), jnp.float32),
        ),
        grid=(num_tiles,),
        in_specs=[tile_spec(), tile_spec(), tile_spec(), tile_spec()],
        out_specs=(tile_spec(), part_spec(), part_spec()),
        compiler_params=pltpu.CompilerParams(
            dimension_semantics=("parallel",),
            vmem_limit_bytes=VMEM_LIMIT),
    )(a_s, b_s, lbl_s, msk_s)

    score = score_s.reshape(-1)[:E]
    # Masked mean with one global divide (padded entries have msk == 0).
    # NOTE: divides by zero (NaN) if the mask is empty — same as the reference.
    loss = jnp.sum(num_parts) / jnp.sum(cnt_parts)
    return score, loss


# ------------------------------ pure-JAX reference -----------------------------
def big_ec_reference(params, x, edge_index, edge_labels, edge_train_mask,
                     *, alpha, gamma):
    h = x @ params["wd"].T
    hs, hd = h[edge_index[0]], h[edge_index[1]]
    e = jnp.concatenate([hs, hd, hs - hd], axis=1)
    s = (e @ params["wf"].T).reshape(-1)
    score = jax.nn.sigmoid(s)
    p = jax.nn.sigmoid(score)
    lbl = edge_labels.astype(jnp.float32)
    logpt = jnp.where(lbl == 1.0, jnp.log(p), jnp.log(1.0 - p))
    pt = jnp.exp(logpt)
    at = jnp.where(lbl == 0.0, alpha, 1.0 - alpha)
    per_edge = -1.0 * (1.0 - pt) ** gamma * (logpt * at)
    m = edge_train_mask.astype(jnp.float32)
    loss = jnp.sum(per_edge * m) / jnp.sum(m)
    return score, loss


# ------------------------------------- main -------------------------------------
if __name__ == "__main__":
    in_channels, out_channels = 32, 16
    num_nodes, num_edges = 8, 16
    alpha, gamma = 0.25, 2.0

    key = jax.random.PRNGKey(0)
    k_x, k_wd, k_wf, k_ei, k_lbl, k_msk = jax.random.split(key, 6)

    params = {
        "wd": 0.1 * jax.random.normal(k_wd, (out_channels, in_channels),
                                      dtype=jnp.float32),
        "wf": 0.1 * jax.random.normal(k_wf, (1, 3 * out_channels),
                                      dtype=jnp.float32),
    }

    x = jax.random.normal(k_x, (num_nodes, in_channels), dtype=jnp.float32)
    edge_index = jax.random.randint(k_ei, (2, num_edges), 0, num_nodes,
                                    dtype=jnp.int32)
    edge_labels = jax.random.bernoulli(k_lbl, 0.5, (num_edges,)).astype(
        jnp.float32)
    edge_train_mask = jax.random.bernoulli(k_msk, 0.6, (num_edges,))
    edge_train_mask = edge_train_mask.at[0].set(True)   # ensure non-empty mask

    score, loss = big_ec_forward(params, x, edge_index, edge_labels,
                                 edge_train_mask, alpha=alpha, gamma=gamma)
    jax.block_until_ready((score, loss))

    ref_score, ref_loss = big_ec_reference(params, x, edge_index, edge_labels,
                                           edge_train_mask, alpha=alpha,
                                           gamma=gamma)
    assert jnp.allclose(score, ref_score, atol=1e-5, rtol=1e-5)
    assert jnp.allclose(loss, ref_loss, atol=1e-5, rtol=1e-5)

    print("KERNEL_OK")
</pallas_src>

<mosaic_0001>
module attributes {stable_mosaic.version = 11 : i64} {
  func.func @_node_kernel(%arg0: i32, %arg1: memref<8x32xf32, #tpu.memory_space<vmem>>, %arg2: memref<32x2xf32, #tpu.memory_space<vmem>>, %arg3: memref<8x2xf32, #tpu.memory_space<vmem>>) attributes {dimension_semantics = [#tpu.dimension_semantics<parallel>], iteration_bounds = array<i64: 1>, scalar_prefetch = 0 : i64, scratch_operands = 0 : i64, tpu.core_type = #tpu.core_type<tc>, window_params = [{transform_indices = @transform_0, window_bounds = array<i64: 8, 32>}, {pipeline_mode = #tpu.pipeline_mode<synchronous>, transform_indices = @transform_1, window_bounds = array<i64: 32, 2>}, {transform_indices = @transform_2, window_bounds = array<i64: 8, 2>}]} {
    %c0 = arith.constant 0 : index
    %c0_0 = arith.constant 0 : index
    %0 = vector.load %arg1[%c0, %c0_0] : memref<8x32xf32, #tpu.memory_space<vmem>>, vector<8x32xf32>
    %c0_1 = arith.constant 0 : index
    %c0_2 = arith.constant 0 : index
    %1 = vector.load %arg2[%c0_1, %c0_2] : memref<32x2xf32, #tpu.memory_space<vmem>>, vector<32x2xf32>
    %cst = arith.constant dense<0.000000e+00> : vector<8x2xf32>
    %2 = tpu.matmul %0, %1, %cst {dimension_numbers = #tpu.dot_dimension_numbers<[1], [0], [0], [1], [0, 0, 1, 1], [], []>} : vector<8x32xf32>, vector<32x2xf32>, vector<8x2xf32> -> vector<8x2xf32>
    %c0_3 = arith.constant 0 : index
    %c0_4 = arith.constant 0 : index
    %3 = vector.load %arg3[%c0_3, %c0_4] : memref<8x2xf32, #tpu.memory_space<vmem>>, vector<8x2xf32>
    tpu.vector_store %arg3[%c0_3, %c0_4], %2 {strides = array<i32>} : memref<8x2xf32, #tpu.memory_space<vmem>>, vector<8x2xf32>,
    return
  }
  func.func @transform_0(%arg0: i32) -> (i32, i32) {
    %c0_i32 = arith.constant 0 : i32
    %c0_i32_0 = arith.constant 0 : i32
    return %arg0, %c0_i32 : i32, i32
  }
  func.func @transform_1(%arg0: i32) -> (i32, i32) {
    %c0_i32 = arith.constant 0 : i32
    %c0_i32_0 = arith.constant 0 : i32
    %c0_i32_1 = arith.constant 0 : i32
    return %c0_i32, %c0_i32_0 : i32, i32
  }
  func.func @transform_2(%arg0: i32) -> (i32, i32) {
    %c0_i32 = arith.constant 0 : i32
    %c0_i32_0 = arith.constant 0 : i32
    return %arg0, %c0_i32 : i32, i32
  }
}

</mosaic_0001>

<bundles_post_ra>
// kernel: tpu_custom_call.1
= control target key start
LH: loop header
LB: loop body
LE: loop exit
PB: predicated region body
PF: predicated region fallthrough
CT: control target
= control target key end

     0   :  { %v115_v0 = vmov 0.0   ;;  %vm116_vm0 = vmmov 0   ;;  %vm16_vm1 = vcmask 261120   ;;  %vm90_vm2 = vcmask 15360   ;;  %s150_s1 = inlined_call_operand.vmem [shape: f32[32,2], index: 1, kind: input, shape index: {}]   ;;  %s151_s0 = inlined_call_operand.vmem [shape: f32[8,32], index: 0, kind: input, shape index: {}]   ;;  %s152_s2 = inlined_call_operand.vmem [shape: f32[8,2], index: 2, kind: output, shape index: {}]  }
   0x1   :  { %102 = vmatprep.subr.mxu0 %v115_v0  ;;  %v15_v1 = vld [vmem:[%s150_s1 + $0x18] sm:$0xff]  ;;  %v14_v2 = vld [vmem:[%s150_s1 + $0x10] sm:$0xff]  ;;  %110 = vmatprep.mubr.msk.f32.mxu0 %vm116_vm0, %v115_v0  ;;  %v13_v3 = vld [vmem:[%s150_s1 + $0x8] sm:$0xff] }
   0x2   :  { %103 = vmatpush3.msra.mxu0 %v15_v1  ;;  %v12_v4 = vld [vmem:[%s150_s1] sm:$0xff] }
   0x3   :  { %104 = vmatprep.subr.mxu0 %v115_v0  ;;  %v11_v5 = vld [vmem:[%s151_s0] sm:$0xff] }
   0x4   :  { %105 = vmatpush3.msra.mxu0 %v14_v2 }
   0x5   :  { %106 = vmatprep.subr.mxu0 %v115_v0 }
   0x6   :  { %107 = vmatpush3.msra.mxu0 %v13_v3 }
   0x7   :  { %108 = vmatprep.subr.mxu0 %v115_v0 }
   0x8   :  { %109 = vmatpush3.msra.mxu0 %v12_v4 }
   0x9   :  { %111 = vmatmul.mubr.msk.f32.vlgmr.msra.gmra.mxu0 %vm16_vm1, %v11_v5 }
  0xc9   :  { %v86_v6 = vpop.f32.mrf.mxu0 }
  0xca   :  { %91 = vst.msk [vmem:[%s152_s2] sm:$0xff] %vm90_vm2, %v86_v6 }
  0xcb   :  { %v112_v7 = vpop.f32.mrf.mxu0 }

</bundles_post_ra>
